<compile_context>
chip_gen: v5e
topology: v5e:2x2
jax: 0.10.0
libtpu: 0.0.40
codegen_flags: <defaults>
</compile_context>

<pallas_src>
import jax
import jax.numpy as jnp
from jax.experimental import pallas as pl
from jax.experimental.pallas import tpu as pltpu

N_H = 6  # hidden width of both hidden layers

# Offsets into the flattened parameter vector (total = 61 scalars).
W1_OFF = 0            # 6  : weight from the single input to hidden unit j
B1_OFF = W1_OFF + 6   # 6
W2_OFF = B1_OFF + 6   # 36 : [j_in * 6 + k_out]
B2_OFF = W2_OFF + 36  # 6
W3_OFF = B2_OFF + 6   # 6  : weight from hidden unit k to the single output
B3_OFF = W3_OFF + 6   # 1
N_PARAMS = B3_OFF + 1


def mlp_kernel(p_ref, x_ref, o_ref):
    """p_ref: SMEM f32[61] flattened params; x_ref/o_ref: VMEM (tm, 128) f32."""
    x = x_ref[...]

    # layer1 + tanh : h1_j = tanh(w1_j * x + b1_j)   (6 FMAs + 6 tanh)
    h1 = [
        jnp.tanh(p_ref[W1_OFF + j] * x + p_ref[B1_OFF + j])
        for j in range(N_H)
    ]

    # layer2 + tanh : h2_k = tanh(sum_j w2[j,k] * h1_j + b2_k)   (36 FMAs + 6 tanh)
    h2 = []
    for k in range(N_H):
        s = h1[0] * p_ref[W2_OFF + k]
        for j in range(1, N_H):
            s = s + h1[j] * p_ref[W2_OFF + j * N_H + k]
        h2.append(jnp.tanh(s + p_ref[B2_OFF + k]))

    # output layer (no activation) : out = sum_k w3_k * h2_k + b3   (6 FMAs)
    out = h2[0] * p_ref[W3_OFF]
    for k in range(1, N_H):
        out = out + h2[k] * p_ref[W3_OFF + k]
    o_ref[...] = out + p_ref[B3_OFF]


def func_fit_forward(x, params, *, block_rows=512, lanes=128):
    """x: (N, 1) float32.  params: dict of weights/biases (stored as (in, out))."""
    n = x.shape[0]

    # Flatten all 61 weight/bias scalars into a single 1-D SMEM-resident vector.
    p = jnp.concatenate([
        params["w1"].reshape(-1), params["b1"].reshape(-1),
        params["w2"].reshape(-1), params["b2"].reshape(-1),
        params["w3"].reshape(-1), params["b3"].reshape(-1),
    ]).astype(jnp.float32)
    assert p.shape[0] == N_PARAMS

    # Lane-dense reshape: (N, 1) -> (rows_padded, 128), batch on both axes.
    xf = x.reshape(-1).astype(jnp.float32)
    rows = pl.cdiv(n, lanes)
    tm = min(block_rows, max(8, ((rows + 7) // 8) * 8))     # sublane multiple of 8
    rows_padded = ((rows + tm - 1) // tm) * tm
    n_padded = rows_padded * lanes
    xf = jnp.pad(xf, (0, n_padded - n))
    x2 = xf.reshape(rows_padded, lanes)

    out2 = pl.pallas_call(
        mlp_kernel,
        out_shape=jax.ShapeDtypeStruct((rows_padded, lanes), jnp.float32),
        grid_spec=pltpu.PrefetchScalarGridSpec(
            num_scalar_prefetch=0,
            grid=(rows_padded // tm,),
            in_specs=[
                # 61 scalars -> SMEM (scalar reads, no VMEM vector pipeline)
                pl.BlockSpec(memory_space=pltpu.MemorySpace.SMEM),
                # lane-dense batch tile, 256 KiB at (512, 128) f32
                pl.BlockSpec((tm, lanes), lambda i: (i, 0)),
            ],
            out_specs=pl.BlockSpec((tm, lanes), lambda i: (i, 0)),
        ),
        compiler_params=pltpu.CompilerParams(
            dimension_semantics=("parallel",),   # shard batch tiles across TCs
        ),
    )(p, x2)

    # Drop padding and restore the (N, 1) module output shape.
    return out2.reshape(-1)[:n].reshape(n, 1)


def init_params(key):
    """Deterministic init matching PyTorch Linear shapes (weights stored as (in, out))."""
    k1, k2, k3, k4, k5, k6 = jax.random.split(key, 6)

    def uniform(k, shape, fan_in):
        bound = 1.0 / jnp.sqrt(float(fan_in))
        return jax.random.uniform(k, shape, jnp.float32, -bound, bound)

    return {
        # layer1: Linear(1, 6)   -> W.T shape (1, 6)
        "w1": uniform(k1, (1, 6), 1),
        "b1": uniform(k2, (6,), 1),
        # layer2: Linear(6, 6)   -> W.T shape (6, 6), [in, out]
        "w2": uniform(k3, (6, 6), 6),
        "b2": uniform(k4, (6,), 6),
        # output_layer: Linear(6, 1) -> W.T shape (6, 1)
        "w3": uniform(k5, (6, 1), 6),
        "b3": uniform(k6, (1,), 6),
    }


def reference_forward(x, p):
    h1 = jnp.tanh(x @ p["w1"] + p["b1"])
    h2 = jnp.tanh(h1 @ p["w2"] + p["b2"])
    return h2 @ p["w3"] + p["b3"]


if __name__ == "__main__":
    key = jax.random.PRNGKey(0)
    k_param, k_x = jax.random.split(key)

    params = init_params(k_param)
    # small batch of scalar inputs (non-multiple of 128 to exercise padding)
    x = jax.random.normal(k_x, (1000, 1), jnp.float32)

    out = func_fit_forward(x, params)
    out = jax.block_until_ready(out)

    ref = reference_forward(x, params)
    assert out.shape == (1000, 1)
    assert jnp.allclose(out, ref, atol=1e-5, rtol=1e-5)

    print("KERNEL_OK")
</pallas_src>

<mosaic_0001>
module attributes {stable_mosaic.version = 11 : i64} {
  func.func @mlp_kernel(%arg0: i32, %arg1: memref<61xf32, #tpu.memory_space<smem>>, %arg2: memref<8x128xf32, #tpu.memory_space<vmem>>, %arg3: memref<8x128xf32, #tpu.memory_space<vmem>>) attributes {dimension_semantics = [#tpu.dimension_semantics<parallel>], iteration_bounds = array<i64: 1>, scalar_prefetch = 0 : i64, scratch_operands = 0 : i64, tpu.core_type = #tpu.core_type<tc>, window_params = [{transform_indices = @transform_0, window_bounds = array<i64: 61>}, {transform_indices = @transform_1, window_bounds = array<i64: 8, 128>}, {transform_indices = @transform_2, window_bounds = array<i64: 8, 128>}]} {
    %c0 = arith.constant 0 : index
    %c0_0 = arith.constant 0 : index
    %0 = vector.load %arg2[%c0, %c0_0] : memref<8x128xf32, #tpu.memory_space<vmem>>, vector<8x128xf32>
    %c0_1 = arith.constant 0 : index
    %1 = memref.load %arg1[%c0_1] : memref<61xf32, #tpu.memory_space<smem>>
    %2 = vector.broadcast %1 : f32 to vector<8x128xf32>
    %3 = arith.mulf %2, %0 : vector<8x128xf32>
    %c6 = arith.constant 6 : index
    %4 = memref.load %arg1[%c6] : memref<61xf32, #tpu.memory_space<smem>>
    %5 = vector.broadcast %4 : f32 to vector<8x128xf32>
    %6 = arith.addf %3, %5 : vector<8x128xf32>
    %7 = math.tanh %6 : vector<8x128xf32>
    %c1 = arith.constant 1 : index
    %8 = memref.load %arg1[%c1] : memref<61xf32, #tpu.memory_space<smem>>
    %9 = vector.broadcast %8 : f32 to vector<8x128xf32>
    %10 = arith.mulf %9, %0 : vector<8x128xf32>
    %c7 = arith.constant 7 : index
    %11 = memref.load %arg1[%c7] : memref<61xf32, #tpu.memory_space<smem>>
    %12 = vector.broadcast %11 : f32 to vector<8x128xf32>
    %13 = arith.addf %10, %12 : vector<8x128xf32>
    %14 = math.tanh %13 : vector<8x128xf32>
    %c2 = arith.constant 2 : index
    %15 = memref.load %arg1[%c2] : memref<61xf32, #tpu.memory_space<smem>>
    %16 = vector.broadcast %15 : f32 to vector<8x128xf32>
    %17 = arith.mulf %16, %0 : vector<8x128xf32>
    %c8 = arith.constant 8 : index
    %18 = memref.load %arg1[%c8] : memref<61xf32, #tpu.memory_space<smem>>
    %19 = vector.broadcast %18 : f32 to vector<8x128xf32>
    %20 = arith.addf %17, %19 : vector<8x128xf32>
    %21 = math.tanh %20 : vector<8x128xf32>
    %c3 = arith.constant 3 : index
    %22 = memref.load %arg1[%c3] : memref<61xf32, #tpu.memory_space<smem>>
    %23 = vector.broadcast %22 : f32 to vector<8x128xf32>
    %24 = arith.mulf %23, %0 : vector<8x128xf32>
    %c9 = arith.constant 9 : index
    %25 = memref.load %arg1[%c9] : memref<61xf32, #tpu.memory_space<smem>>
    %26 = vector.broadcast %25 : f32 to vector<8x128xf32>
    %27 = arith.addf %24, %26 : vector<8x128xf32>
    %28 = math.tanh %27 : vector<8x128xf32>
    %c4 = arith.constant 4 : index
    %29 = memref.load %arg1[%c4] : memref<61xf32, #tpu.memory_space<smem>>
    %30 = vector.broadcast %29 : f32 to vector<8x128xf32>
    %31 = arith.mulf %30, %0 : vector<8x128xf32>
    %c10 = arith.constant 10 : index
    %32 = memref.load %arg1[%c10] : memref<61xf32, #tpu.memory_space<smem>>
    %33 = vector.broadcast %32 : f32 to vector<8x128xf32>
    %34 = arith.addf %31, %33 : vector<8x128xf32>
    %35 = math.tanh %34 : vector<8x128xf32>
    %c5 = arith.constant 5 : index
    %36 = memref.load %arg1[%c5] : memref<61xf32, #tpu.memory_space<smem>>
    %37 = vector.broadcast %36 : f32 to vector<8x128xf32>
    %38 = arith.mulf %37, %0 : vector<8x128xf32>
    %c11 = arith.constant 11 : index
    %39 = memref.load %arg1[%c11] : memref<61xf32, #tpu.memory_space<smem>>
    %40 = vector.broadcast %39 : f32 to vector<8x128xf32>
    %41 = arith.addf %38, %40 : vector<8x128xf32>
    %42 = math.tanh %41 : vector<8x128xf32>
    %c12 = arith.constant 12 : index
    %43 = memref.load %arg1[%c12] : memref<61xf32, #tpu.memory_space<smem>>
    %44 = vector.broadcast %43 : f32 to vector<8x128xf32>
    %45 = arith.mulf %7, %44 : vector<8x128xf32>
    %c18 = arith.constant 18 : index
    %46 = memref.load %arg1[%c18] : memref<61xf32, #tpu.memory_space<smem>>
    %47 = vector.broadcast %46 : f32 to vector<8x128xf32>
    %48 = arith.mulf %14, %47 : vector<8x128xf32>
    %49 = arith.addf %45, %48 : vector<8x128xf32>
    %c24 = arith.constant 24 : index
    %50 = memref.load %arg1[%c24] : memref<61xf32, #tpu.memory_space<smem>>
    %51 = vector.broadcast %50 : f32 to vector<8x128xf32>
    %52 = arith.mulf %21, %51 : vector<8x128xf32>
    %53 = arith.addf %49, %52 : vector<8x128xf32>
    %c30 = arith.constant 30 : index
    %54 = memref.load %arg1[%c30] : memref<61xf32, #tpu.memory_space<smem>>
    %55 = vector.broadcast %54 : f32 to vector<8x128xf32>
    %56 = arith.mulf %28, %55 : vector<8x128xf32>
    %57 = arith.addf %53, %56 : vector<8x128xf32>
    %c36 = arith.constant 36 : index
    %58 = memref.load %arg1[%c36] : memref<61xf32, #tpu.memory_space<smem>>
    %59 = vector.broadcast %58 : f32 to vector<8x128xf32>
    %60 = arith.mulf %35, %59 : vector<8x128xf32>
    %61 = arith.addf %57, %60 : vector<8x128xf32>
    %c42 = arith.constant 42 : index
    %62 = memref.load %arg1[%c42] : memref<61xf32, #tpu.memory_space<smem>>
    %63 = vector.broadcast %62 : f32 to vector<8x128xf32>
    %64 = arith.mulf %42, %63 : vector<8x128xf32>
    %65 = arith.addf %61, %64 : vector<8x128xf32>
    %c48 = arith.constant 48 : index
    %66 = memref.load %arg1[%c48] : memref<61xf32, #tpu.memory_space<smem>>
    %67 = vector.broadcast %66 : f32 to vector<8x128xf32>
    %68 = arith.addf %65, %67 : vector<8x128xf32>
    %69 = math.tanh %68 : vector<8x128xf32>
    %c13 = arith.constant 13 : index
    %70 = memref.load %arg1[%c13] : memref<61xf32, #tpu.memory_space<smem>>
    %71 = vector.broadcast %70 : f32 to vector<8x128xf32>
    %72 = arith.mulf %7, %71 : vector<8x128xf32>
    %c19 = arith.constant 19 : index
    %73 = memref.load %arg1[%c19] : memref<61xf32, #tpu.memory_space<smem>>
    %74 = vector.broadcast %73 : f32 to vector<8x128xf32>
    %75 = arith.mulf %14, %74 : vector<8x128xf32>
    %76 = arith.addf %72, %75 : vector<8x128xf32>
    %c25 = arith.constant 25 : index
    %77 = memref.load %arg1[%c25] : memref<61xf32, #tpu.memory_space<smem>>
    %78 = vector.broadcast %77 : f32 to vector<8x128xf32>
    %79 = arith.mulf %21, %78 : vector<8x128xf32>
    %80 = arith.addf %76, %79 : vector<8x128xf32>
    %c31 = arith.constant 31 : index
    %81 = memref.load %arg1[%c31] : memref<61xf32, #tpu.memory_space<smem>>
    %82 = vector.broadcast %81 : f32 to vector<8x128xf32>
    %83 = arith.mulf %28, %82 : vector<8x128xf32>
    %84 = arith.addf %80, %83 : vector<8x128xf32>
    %c37 = arith.constant 37 : index
    %85 = memref.load %arg1[%c37] : memref<61xf32, #tpu.memory_space<smem>>
    %86 = vector.broadcast %85 : f32 to vector<8x128xf32>
    %87 = arith.mulf %35, %86 : vector<8x128xf32>
    %88 = arith.addf %84, %87 : vector<8x128xf32>
    %c43 = arith.constant 43 : index
    %89 = memref.load %arg1[%c43] : memref<61xf32, #tpu.memory_space<smem>>
    %90 = vector.broadcast %89 : f32 to vector<8x128xf32>
    %91 = arith.mulf %42, %90 : vector<8x128xf32>
    %92 = arith.addf %88, %91 : vector<8x128xf32>
    %c49 = arith.constant 49 : index
    %93 = memref.load %arg1[%c49] : memref<61xf32, #tpu.memory_space<smem>>
    %94 = vector.broadcast %93 : f32 to vector<8x128xf32>
    %95 = arith.addf %92, %94 : vector<8x128xf32>
    %96 = math.tanh %95 : vector<8x128xf32>
    %c14 = arith.constant 14 : index
    %97 = memref.load %arg1[%c14] : memref<61xf32, #tpu.memory_space<smem>>
    %98 = vector.broadcast %97 : f32 to vector<8x128xf32>
    %99 = arith.mulf %7, %98 : vector<8x128xf32>
    %c20 = arith.constant 20 : index
    %100 = memref.load %arg1[%c20] : memref<61xf32, #tpu.memory_space<smem>>
    %101 = vector.broadcast %100 : f32 to vector<8x128xf32>
    %102 = arith.mulf %14, %101 : vector<8x128xf32>
    %103 = arith.addf %99, %102 : vector<8x128xf32>
    %c26 = arith.constant 26 : index
    %104 = memref.load %arg1[%c26] : memref<61xf32, #tpu.memory_space<smem>>
    %105 = vector.broadcast %104 : f32 to vector<8x128xf32>
    %106 = arith.mulf %21, %105 : vector<8x128xf32>
    %107 = arith.addf %103, %106 : vector<8x128xf32>
    %c32 = arith.constant 32 : index
    %108 = memref.load %arg1[%c32] : memref<61xf32, #tpu.memory_space<smem>>
    %109 = vector.broadcast %108 : f32 to vector<8x128xf32>
    %110 = arith.mulf %28, %109 : vector<8x128xf32>
    %111 = arith.addf %107, %110 : vector<8x128xf32>
    %c38 = arith.constant 38 : index
    %112 = memref.load %arg1[%c38] : memref<61xf32, #tpu.memory_space<smem>>
    %113 = vector.broadcast %112 : f32 to vector<8x128xf32>
    %114 = arith.mulf %35, %113 : vector<8x128xf32>
    %115 = arith.addf %111, %114 : vector<8x128xf32>
    %c44 = arith.constant 44 : index
    %116 = memref.load %arg1[%c44] : memref<61xf32, #tpu.memory_space<smem>>
    %117 = vector.broadcast %116 : f32 to vector<8x128xf32>
    %118 = arith.mulf %42, %117 : vector<8x128xf32>
    %119 = arith.addf %115, %118 : vector<8x128xf32>
    %c50 = arith.constant 50 : index
    %120 = memref.load %arg1[%c50] : memref<61xf32, #tpu.memory_space<smem>>
    %121 = vector.broadcast %120 : f32 to vector<8x128xf32>
    %122 = arith.addf %119, %121 : vector<8x128xf32>
    %123 = math.tanh %122 : vector<8x128xf32>
    %c15 = arith.constant 15 : index
    %124 = memref.load %arg1[%c15] : memref<61xf32, #tpu.memory_space<smem>>
    %125 = vector.broadcast %124 : f32 to vector<8x128xf32>
    %126 = arith.mulf %7, %125 : vector<8x128xf32>
    %c21 = arith.constant 21 : index
    %127 = memref.load %arg1[%c21] : memref<61xf32, #tpu.memory_space<smem>>
    %128 = vector.broadcast %127 : f32 to vector<8x128xf32>
    %129 = arith.mulf %14, %128 : vector<8x128xf32>
    %130 = arith.addf %126, %129 : vector<8x128xf32>
    %c27 = arith.constant 27 : index
    %131 = memref.load %arg1[%c27] : memref<61xf32, #tpu.memory_space<smem>>
    %132 = vector.broadcast %131 : f32 to vector<8x128xf32>
    %133 = arith.mulf %21, %132 : vector<8x128xf32>
    %134 = arith.addf %130, %133 : vector<8x128xf32>
    %c33 = arith.constant 33 : index
    %135 = memref.load %arg1[%c33] : memref<61xf32, #tpu.memory_space<smem>>
    %136 = vector.broadcast %135 : f32 to vector<8x128xf32>
    %137 = arith.mulf %28, %136 : vector<8x128xf32>
    %138 = arith.addf %134, %137 : vector<8x128xf32>
    %c39 = arith.constant 39 : index
    %139 = memref.load %arg1[%c39] : memref<61xf32, #tpu.memory_space<smem>>
    %140 = vector.broadcast %139 : f32 to vector<8x128xf32>
    %141 = arith.mulf %35, %140 : vector<8x128xf32>
    %142 = arith.addf %138, %141 : vector<8x128xf32>
    %c45 = arith.constant 45 : index
    %143 = memref.load %arg1[%c45] : memref<61xf32, #tpu.memory_space<smem>>
    %144 = vector.broadcast %143 : f32 to vector<8x128xf32>
    %145 = arith.mulf %42, %144 : vector<8x128xf32>
    %146 = arith.addf %142, %145 : vector<8x128xf32>
    %c51 = arith.constant 51 : index
    %147 = memref.load %arg1[%c51] : memref<61xf32, #tpu.memory_space<smem>>
    %148 = vector.broadcast %147 : f32 to vector<8x128xf32>
    %149 = arith.addf %146, %148 : vector<8x128xf32>
    %150 = math.tanh %149 : vector<8x128xf32>
    %c16 = arith.constant 16 : index
    %151 = memref.load %arg1[%c16] : memref<61xf32, #tpu.memory_space<smem>>
    %152 = vector.broadcast %151 : f32 to vector<8x128xf32>
    %153 = arith.mulf %7, %152 : vector<8x128xf32>
    %c22 = arith.constant 22 : index
    %154 = memref.load %arg1[%c22] : memref<61xf32, #tpu.memory_space<smem>>
    %155 = vector.broadcast %154 : f32 to vector<8x128xf32>
    %156 = arith.mulf %14, %155 : vector<8x128xf32>
    %157 = arith.addf %153, %156 : vector<8x128xf32>
    %c28 = arith.constant 28 : index
    %158 = memref.load %arg1[%c28] : memref<61xf32, #tpu.memory_space<smem>>
    %159 = vector.broadcast %158 : f32 to vector<8x128xf32>
    %160 = arith.mulf %21, %159 : vector<8x128xf32>
    %161 = arith.addf %157, %160 : vector<8x128xf32>
    %c34 = arith.constant 34 : index
    %162 = memref.load %arg1[%c34] : memref<61xf32, #tpu.memory_space<smem>>
    %163 = vector.broadcast %162 : f32 to vector<8x128xf32>
    %164 = arith.mulf %28, %163 : vector<8x128xf32>
    %165 = arith.addf %161, %164 : vector<8x128xf32>
    %c40 = arith.constant 40 : index
    %166 = memref.load %arg1[%c40] : memref<61xf32, #tpu.memory_space<smem>>
    %167 = vector.broadcast %166 : f32 to vector<8x128xf32>
    %168 = arith.mulf %35, %167 : vector<8x128xf32>
    %169 = arith.addf %165, %168 : vector<8x128xf32>
    %c46 = arith.constant 46 : index
    %170 = memref.load %arg1[%c46] : memref<61xf32, #tpu.memory_space<smem>>
    %171 = vector.broadcast %170 : f32 to vector<8x128xf32>
    %172 = arith.mulf %42, %171 : vector<8x128xf32>
    %173 = arith.addf %169, %172 : vector<8x128xf32>
    %c52 = arith.constant 52 : index
    %174 = memref.load %arg1[%c52] : memref<61xf32, #tpu.memory_space<smem>>
    %175 = vector.broadcast %174 : f32 to vector<8x128xf32>
    %176 = arith.addf %173, %175 : vector<8x128xf32>
    %177 = math.tanh %176 : vector<8x128xf32>
    %c17 = arith.constant 17 : index
    %178 = memref.load %arg1[%c17] : memref<61xf32, #tpu.memory_space<smem>>
    %179 = vector.broadcast %178 : f32 to vector<8x128xf32>
    %180 = arith.mulf %7, %179 : vector<8x128xf32>
    %c23 = arith.constant 23 : index
    %181 = memref.load %arg1[%c23] : memref<61xf32, #tpu.memory_space<smem>>
    %182 = vector.broadcast %181 : f32 to vector<8x128xf32>
    %183 = arith.mulf %14, %182 : vector<8x128xf32>
    %184 = arith.addf %180, %183 : vector<8x128xf32>
    %c29 = arith.constant 29 : index
    %185 = memref.load %arg1[%c29] : memref<61xf32, #tpu.memory_space<smem>>
    %186 = vector.broadcast %185 : f32 to vector<8x128xf32>
    %187 = arith.mulf %21, %186 : vector<8x128xf32>
    %188 = arith.addf %184, %187 : vector<8x128xf32>
    %c35 = arith.constant 35 : index
    %189 = memref.load %arg1[%c35] : memref<61xf32, #tpu.memory_space<smem>>
    %190 = vector.broadcast %189 : f32 to vector<8x128xf32>
    %191 = arith.mulf %28, %190 : vector<8x128xf32>
    %192 = arith.addf %188, %191 : vector<8x128xf32>
    %c41 = arith.constant 41 : index
    %193 = memref.load %arg1[%c41] : memref<61xf32, #tpu.memory_space<smem>>
    %194 = vector.broadcast %193 : f32 to vector<8x128xf32>
    %195 = arith.mulf %35, %194 : vector<8x128xf32>
    %196 = arith.addf %192, %195 : vector<8x128xf32>
    %c47 = arith.constant 47 : index
    %197 = memref.load %arg1[%c47] : memref<61xf32, #tpu.memory_space<smem>>
    %198 = vector.broadcast %197 : f32 to vector<8x128xf32>
    %199 = arith.mulf %42, %198 : vector<8x128xf32>
    %200 = arith.addf %196, %199 : vector<8x128xf32>
    %c53 = arith.constant 53 : index
    %201 = memref.load %arg1[%c53] : memref<61xf32, #tpu.memory_space<smem>>
    %202 = vector.broadcast %201 : f32 to vector<8x128xf32>
    %203 = arith.addf %200, %202 : vector<8x128xf32>
    %204 = math.tanh %203 : vector<8x128xf32>
    %c54 = arith.constant 54 : index
    %205 = memref.load %arg1[%c54] : memref<61xf32, #tpu.memory_space<smem>>
    %206 = vector.broadcast %205 : f32 to vector<8x128xf32>
    %207 = arith.mulf %69, %206 : vector<8x128xf32>
    %c55 = arith.constant 55 : index
    %208 = memref.load %arg1[%c55] : memref<61xf32, #tpu.memory_space<smem>>
    %209 = vector.broadcast %208 : f32 to vector<8x128xf32>
    %210 = arith.mulf %96, %209 : vector<8x128xf32>
    %211 = arith.addf %207, %210 : vector<8x128xf32>
    %c56 = arith.constant 56 : index
    %212 = memref.load %arg1[%c56] : memref<61xf32, #tpu.memory_space<smem>>
    %213 = vector.broadcast %212 : f32 to vector<8x128xf32>
    %214 = arith.mulf %123, %213 : vector<8x128xf32>
    %215 = arith.addf %211, %214 : vector<8x128xf32>
    %c57 = arith.constant 57 : index
    %216 = memref.load %arg1[%c57] : memref<61xf32, #tpu.memory_space<smem>>
    %217 = vector.broadcast %216 : f32 to vector<8x128xf32>
    %218 = arith.mulf %150, %217 : vector<8x128xf32>
    %219 = arith.addf %215, %218 : vector<8x128xf32>
    %c58 = arith.constant 58 : index
    %220 = memref.load %arg1[%c58] : memref<61xf32, #tpu.memory_space<smem>>
    %221 = vector.broadcast %220 : f32 to vector<8x128xf32>
    %222 = arith.mulf %177, %221 : vector<8x128xf32>
    %223 = arith.addf %219, %222 : vector<8x128xf32>
    %c59 = arith.constant 59 : index
    %224 = memref.load %arg1[%c59] : memref<61xf32, #tpu.memory_space<smem>>
    %225 = vector.broadcast %224 : f32 to vector<8x128xf32>
    %226 = arith.mulf %204, %225 : vector<8x128xf32>
    %227 = arith.addf %223, %226 : vector<8x128xf32>
    %c60 = arith.constant 60 : index
    %228 = memref.load %arg1[%c60] : memref<61xf32, #tpu.memory_space<smem>>
    %229 = vector.broadcast %228 : f32 to vector<8x128xf32>
    %230 = arith.addf %227, %229 : vector<8x128xf32>
    %c0_2 = arith.constant 0 : index
    %c0_3 = arith.constant 0 : index
    %231 = vector.load %arg3[%c0_2, %c0_3] : memref<8x128xf32, #tpu.memory_space<vmem>>, vector<8x128xf32>
    tpu.vector_store %arg3[%c0_2, %c0_3], %230 {strides = array<i32>} : memref<8x128xf32, #tpu.memory_space<vmem>>, vector<8x128xf32>,
    return
  }
  func.func @transform_0(%arg0: i32) -> i32 {
    %c0_i32 = arith.constant 0 : i32
    %c0_i32_0 = arith.constant 0 : i32
    return %c0_i32 : i32
  }
  func.func @transform_1(%arg0: i32) -> (i32, i32) {
    %c0_i32 = arith.constant 0 : i32
    %c0_i32_0 = arith.constant 0 : i32
    return %arg0, %c0_i32 : i32, i32
  }
  func.func @transform_2(%arg0: i32) -> (i32, i32) {
    %c0_i32 = arith.constant 0 : i32
    %c0_i32_0 = arith.constant 0 : i32
    return %arg0, %c0_i32 : i32, i32
  }
}

</mosaic_0001>

<bundles_post_ra>
// kernel: tpu_custom_call.1
= control target key start
LH: loop header
LB: loop body
LE: loop exit
PB: predicated region body
PF: predicated region fallthrough
CT: control target
= control target key end

     0   :  { %7 = vsyncpa [#allocation5], 0  ;;  %s586_s0 = inlined_call_operand.hbm [shape: f32[61], index: 0, kind: input, shape index: {}]   ;;  %s587_s1 = inlined_call_operand.hbm [shape: f32[8,128], index: 1, kind: input, shape index: {}]   ;;  %s588_s2 = inlined_call_operand.hbm [shape: f32[8,128], index: 2, kind: output, shape index: {}]  }
   0x1   :  { %8 = vsyncpa [#allocation3], 0 }
   0x2   :  { %9 = vsyncpa [#allocation4], 0  ;;  %s15_s11 = sshll.u32 %s586_s0, 4  ;;  %s24_s14 = sshll.u32 %s587_s1, 4  ;;  %s16_s11 = int_to_ptr.hbm [resolvable:$true] %s15_s11  ;;  %s25_s14 = int_to_ptr.hbm [resolvable:$true] %s24_s14 }
   0x3   :  { %s442_s15 = smov [#allocation2]   ;;  %s443_s16 = smov [#allocation6]  }
   0x4   :  { %18 = dma.hbm_to_smem %s16_s11, 16, %s442_s15, [#allocation5]  }
   0x5   :  { %s26_s17 = sshll.u32 %s443_s16, 4  ;;  %s27_s17 = int_to_ptr.vmem [resolvable:$true] %s26_s17 }
   0x6   :  { %29 = dma.hbm_to_vmem [thread:$0]  %s25_s14, 128, %s27_s17, [#allocation3]  }
   0x7   :  { %436 = dma.done.wait [#allocation5], 16  }
   0x8   :  { %437 = vsyncadd [#allocation5], 4294967280 }
   0x9   :  { %438 = dma.done.wait [#allocation3], 128  }
   0xa   :  { %439 = vsyncadd [#allocation3], 4294967168 }
   0xb   :  { %38 = sfence }
   0xc   :  { %s40_s18 = sld [smem:[#allocation2]]  ;;  %v39_v0 = vld [vmem:[#allocation6] sm:$0xff] }
   0xd   :  { %s289_s19 = sld [smem:[#allocation2 + $0x6]] }
   0xe   :  { %s290_s0 = sld [smem:[#allocation2 + $0x1]] }
   0xf   :  { %s291_s20 = sld [smem:[#allocation2 + $0x7]] }
  0x10   :  { %s292_s21 = sld [smem:[#allocation2 + $0x2]] }
  0x11   :  { %s293_s22 = sld [smem:[#allocation2 + $0x8]] }
  0x12   :  { %v41_v1 = vstv %s40_s18  ;;  %s294_s1 = sld [smem:[#allocation2 + $0x3]] }
  0x13   :  { %v42_v2 = vmul.f32 %v41_v1, %v39_v0  ;;  %v44_v3 = vstv %s289_s19  ;;  %s295_s23 = sld [smem:[#allocation2 + $0x9]] }
  0x14   :  { %v48_v4 = vstv %s290_s0  ;;  %s296_s24 = sld [smem:[#allocation2 + $0x4]] }
  0x15   :  { %v45_v5 = vadd.f32 %v44_v3, %v42_v2  ;;  %v49_v6 = vmul.f32 %v48_v4, %v39_v0  ;;  %v51_v7 = vstv %s291_s20  ;;  %s466_s25 = sld [smem:[#allocation2 + $0xa]] }
  0x16   :  { %v55_v8 = vstv %s292_s21  ;;  %s468_s26 = sld [smem:[#allocation2 + $0x5]] }
  0x17   :  { %v52_v9 = vadd.f32 %v51_v7, %v49_v6  ;;  %v56_v10 = vmul.f32 %v55_v8, %v39_v0  ;;  %v58_v11 = vstv %s293_s22  ;;  %s470_s27 = sld [smem:[#allocation2 + $0xb]]  ;;  %352 = vtanh.f32 %v45_v5 }
  0x18   :  { %v62_v12 = vstv %s294_s1  ;;  %s300_s28 = sld [smem:[#allocation2 + $0xc]] }
  0x19   :  { %354 = vtanh.f32 %v52_v9  ;;  %v59_v13 = vadd.f32 %v58_v11, %v56_v10  ;;  %v63_v14 = vmul.f32 %v62_v12, %v39_v0  ;;  %v65_v15 = vstv %s295_s23  ;;  %s301_s29 = sld [smem:[#allocation2 + $0x12]] }
  0x1a   :  { %v69_v16 = vstv %s296_s24  ;;  %s472_s30 = sld [smem:[#allocation2 + $0x18]] }
  0x1b   :  { %s474_s3 = sld [smem:[#allocation2 + $0x1e]]  ;;  %356 = vtanh.f32 %v59_v13  ;;  %v66_v17 = vadd.f32 %v65_v15, %v63_v14  ;;  %v70_v18 = vmul.f32 %v69_v16, %v39_v0  ;;  %v72_v19 = vstv %s466_s25 }
  0x1c   :  { %s476_s4 = sld [smem:[#allocation2 + $0x24]]  ;;  %v76_v20 = vstv %s468_s26 }
  0x1d   :  { %s480_s5 = sld [smem:[#allocation2 + $0x2a]]  ;;  %v482_v21 = vpop.eup %352  ;;  %358 = vtanh.f32 %v66_v17  ;;  %v73_v25 = vadd.f32 %v72_v19, %v70_v18  ;;  %v77_v26 = vmul.f32 %v76_v20, %v39_v0  ;;  %v79_v27 = vstv %s470_s27 }
  0x1e   :  { %v83_v22 = vstv %s300_s28  ;;  %s484_s6 = sld [smem:[#allocation2 + $0x30]] }
  0x1f   :  { %v486_v23 = vpop.eup %354  ;;  %v86_v24 = vstv %s301_s29  ;;  %s307_s7 = sld [smem:[#allocation2 + $0xd]]  ;;  %v84_v28 = vmul.f32 %v482_v21, %v83_v22  ;;  %360 = vtanh.f32 %v73_v25  ;;  %v80_v32 = vadd.f32 %v79_v27, %v77_v26 }
  0x20   :  { %s308_s8 = sld [smem:[#allocation2 + $0x13]]  ;;  %v87_v29 = vmul.f32 %v486_v23, %v86_v24  ;;  %v90_v31 = vstv %s472_s30 }
  0x21   :  { %s309_s9 = sld [smem:[#allocation2 + $0x19]]  ;;  %v491_v30 = vpop.eup %356  ;;  %v94_v37 = vstv %s474_s3  ;;  %362 = vtanh.f32 %v80_v32 }
  0x22   :  { %s310_s10 = sld [smem:[#allocation2 + $0x1f]]  ;;  %v88_v33 = vadd.f32 %v87_v29, %v84_v28  ;;  %v91_v34 = vmul.f32 %v491_v30, %v90_v31  ;;  %v98_v48 = vstv %s476_s4 }
  0x23   :  { %s494_s11 = sld [smem:[#allocation2 + $0x25]]  ;;  %v501_v36 = vpop.eup %358  ;;  %v102_v58 = vstv %s480_s5 }
  0x24   :  { %s496_s12 = sld [smem:[#allocation2 + $0x2b]]  ;;  %v92_v43 = vadd.f32 %v91_v34, %v88_v33  ;;  %v95_v44 = vmul.f32 %v501_v36, %v94_v37  ;;  %v106_v25 = vstv %s484_s6 }
  0x25   :  { %v110_v35 = vstv %s307_s7  ;;  %s499_s13 = sld [smem:[#allocation2 + $0x31]]  ;;  %v508_v47 = vpop.eup %360 }
  0x26   :  { %v111_v38 = vmul.f32 %v482_v21, %v110_v35  ;;  %v113_v39 = vstv %s308_s8  ;;  %s314_s14 = sld [smem:[#allocation2 + $0xe]]  ;;  %v96_v53 = vadd.f32 %v95_v44, %v92_v43  ;;  %v99_v54 = vmul.f32 %v508_v47, %v98_v48 }
  0x27   :  { %v114_v40 = vmul.f32 %v486_v23, %v113_v39  ;;  %v117_v41 = vstv %s309_s9  ;;  %s315_s15 = sld [smem:[#allocation2 + $0x14]]  ;;  %v521_v57 = vpop.eup %362 }
  0x28   :  { %v118_v42 = vmul.f32 %v491_v30, %v117_v41  ;;  %s316_s16 = sld [smem:[#allocation2 + $0x1a]]  ;;  %v121_v46 = vstv %s310_s10  ;;  %v100_v5 = vadd.f32 %v99_v54, %v96_v53  ;;  %v103_v6 = vmul.f32 %v521_v57, %v102_v58 }
  0x29   :  { %v115_v45 = vadd.f32 %v114_v40, %v111_v38  ;;  %s317_s17 = sld [smem:[#allocation2 + $0x20]]  ;;  %v122_v50 = vmul.f32 %v501_v36, %v121_v46  ;;  %v125_v51 = vstv %s494_s11 }
  0x2a   :  { %s511_s18 = sld [smem:[#allocation2 + $0x26]]  ;;  %v126_v61 = vmul.f32 %v508_v47, %v125_v51  ;;  %v129_v62 = vstv %s496_s12  ;;  %v104_v19 = vadd.f32 %v103_v6, %v100_v5 }
  0x2b   :  { %s513_s19 = sld [smem:[#allocation2 + $0x2c]]  ;;  %v119_v49 = vadd.f32 %v118_v42, %v115_v45  ;;  %v130_v10 = vmul.f32 %v521_v57, %v129_v62  ;;  %v133_v32 = vstv %s499_s13 }
  0x2c   :  { %v137_v52 = vstv %s314_s14  ;;  %s517_s0 = sld [smem:[#allocation2 + $0x32]]  ;;  %v107_v37 = vadd.f32 %v106_v25, %v104_v19 }
  0x2d   :  { %v138_v55 = vmul.f32 %v482_v21, %v137_v52  ;;  %v140_v56 = vstv %s315_s15  ;;  %s321_s20 = sld [smem:[#allocation2 + $0xf]]  ;;  %v123_v1 = vadd.f32 %v122_v50, %v119_v49 }
  0x2e   :  { %v141_v59 = vmul.f32 %v486_v23, %v140_v56  ;;  %v144_v60 = vstv %s316_s16  ;;  %s322_s21 = sld [smem:[#allocation2 + $0x15]]  ;;  %364 = vtanh.f32 %v107_v37 }
  0x2f   :  { %v145_v63 = vmul.f32 %v491_v30, %v144_v60  ;;  %v148_v0 = vstv %s317_s17  ;;  %s323_s22 = sld [smem:[#allocation2 + $0x1b]]  ;;  %v127_v12 = vadd.f32 %v126_v61, %v123_v1 }
  0x30   :  { %v142_v2 = vadd.f32 %v141_v59, %v138_v55  ;;  %v149_v3 = vmul.f32 %v501_v36, %v148_v0  ;;  %v152_v4 = vstv %s511_s18  ;;  %s324_s1 = sld [smem:[#allocation2 + $0x21]] }
  0x31   :  { %s530_s23 = sld [smem:[#allocation2 + $0x27]]  ;;  %v153_v8 = vmul.f32 %v508_v47, %v152_v4  ;;  %v156_v9 = vstv %s513_s19  ;;  %v131_v29 = vadd.f32 %v130_v10, %v127_v12  ;;  %s444_s19 = smov [#allocation7]  }
  0x32   :  { %v146_v7 = vadd.f32 %v145_v63, %v142_v2  ;;  %s535_s24 = sld [smem:[#allocation2 + $0x2d]]  ;;  %v157_v16 = vmul.f32 %v521_v57, %v156_v9  ;;  %v160_v38 = vstv %s517_s0  ;;  %s276_s0 = sshll.u32 %s444_s19, 4  ;;  %s277_s0 = int_to_ptr.vmem [resolvable:$true] %s276_s0 }
  0x33   :  { %v164_v11 = vstv %s321_s20  ;;  %s538_s25 = sld [smem:[#allocation2 + $0x33]]  ;;  %v134_v44 = vadd.f32 %v133_v32, %v131_v29 }
  0x34   :  { %v150_v13 = vadd.f32 %v149_v3, %v146_v7  ;;  %v165_v14 = vmul.f32 %v482_v21, %v164_v11  ;;  %v167_v15 = vstv %s322_s21  ;;  %s328_s26 = sld [smem:[#allocation2 + $0x10]]  ;;  %v365_v9 = vpop.eup %364 }
  0x35   :  { %v168_v17 = vmul.f32 %v486_v23, %v167_v15  ;;  %v171_v18 = vstv %s323_s22  ;;  %s329_s27 = sld [smem:[#allocation2 + $0x16]]  ;;  %366 = vtanh.f32 %v134_v44  ;;  %s278_s22 = sshll.u32 %s588_s2, 4  ;;  %s279_s22 = int_to_ptr.hbm [resolvable:$true] %s278_s22 }
  0x36   :  { %v154_v20 = vadd.f32 %v153_v8, %v150_v13  ;;  %v172_v22 = vmul.f32 %v491_v30, %v171_v18  ;;  %v175_v24 = vstv %s324_s1  ;;  %s330_s28 = sld [smem:[#allocation2 + $0x1c]] }
  0x37   :  { %v169_v26 = vadd.f32 %v168_v17, %v165_v14  ;;  %v176_v27 = vmul.f32 %v501_v36, %v175_v24  ;;  %v179_v28 = vstv %s530_s23  ;;  %s331_s29 = sld [smem:[#allocation2 + $0x22]] }
  0x38   :  { %v183_v31 = vstv %s535_s24  ;;  %s548_s30 = sld [smem:[#allocation2 + $0x28]]  ;;  %v158_v33 = vadd.f32 %v157_v16, %v154_v20  ;;  %v180_v35 = vmul.f32 %v508_v47, %v179_v28 }
  0x39   :  { %v173_v34 = vadd.f32 %v172_v22, %v169_v26  ;;  %s552_s3 = sld [smem:[#allocation2 + $0x2e]]  ;;  %v184_v41 = vmul.f32 %v521_v57, %v183_v31  ;;  %v187_v52 = vstv %s538_s25 }
  0x3a   :  { %v191_v39 = vstv %s328_s26  ;;  %s555_s4 = sld [smem:[#allocation2 + $0x34]]  ;;  %v161_v48 = vadd.f32 %v160_v38, %v158_v33 }
  0x3b   :  { %v177_v40 = vadd.f32 %v176_v27, %v173_v34  ;;  %v192_v42 = vmul.f32 %v482_v21, %v191_v39  ;;  %v194_v43 = vstv %s329_s27  ;;  %s335_s5 = sld [smem:[#allocation2 + $0x11]] }
  0x3c   :  { %v195_v45 = vmul.f32 %v486_v23, %v194_v43  ;;  %v198_v46 = vstv %s330_s28  ;;  %s336_s6 = sld [smem:[#allocation2 + $0x17]]  ;;  %368 = vtanh.f32 %v161_v48 }
  0x3d   :  { %v181_v49 = vadd.f32 %v180_v35, %v177_v40  ;;  %v199_v50 = vmul.f32 %v491_v30, %v198_v46  ;;  %v202_v51 = vstv %s331_s29  ;;  %s337_s7 = sld [smem:[#allocation2 + $0x1d]] }
  0x3e   :  { %v196_v53 = vadd.f32 %v195_v45, %v192_v42  ;;  %v203_v54 = vmul.f32 %v501_v36, %v202_v51  ;;  %v206_v55 = vstv %s548_s30  ;;  %s338_s8 = sld [smem:[#allocation2 + $0x23]] }
  0x3f   :  { %v185_v56 = vadd.f32 %v184_v41, %v181_v49  ;;  %v210_v58 = vstv %s552_s3  ;;  %s565_s9 = sld [smem:[#allocation2 + $0x29]]  ;;  %v207_v60 = vmul.f32 %v508_v47, %v206_v55 }
  0x40   :  { %v200_v59 = vadd.f32 %v199_v50, %v196_v53  ;;  %s568_s10 = sld [smem:[#allocation2 + $0x2f]]  ;;  %v211_v0 = vmul.f32 %v521_v57, %v210_v58  ;;  %v214_v6 = vstv %s555_s4 }
  0x41   :  { %v188_v61 = vadd.f32 %v187_v52, %v185_v56  ;;  %v218_v62 = vstv %s335_s5  ;;  %s570_s11 = sld [smem:[#allocation2 + $0x35]] }
  0x42   :  { %v204_v63 = vadd.f32 %v203_v54, %v200_v59  ;;  %v219_v1 = vmul.f32 %v482_v21, %v218_v62  ;;  %v221_v2 = vstv %s336_s6  ;;  %s342_s12 = sld [smem:[#allocation2 + $0x36]]  ;;  %v367_v21 = vpop.eup %366 }
  0x43   :  { %v222_v3 = vmul.f32 %v486_v23, %v221_v2  ;;  %v225_v4 = vstv %s337_s7  ;;  %s343_s13 = sld [smem:[#allocation2 + $0x37]]  ;;  %370 = vtanh.f32 %v188_v61  ;;  %v369_v23 = vpop.eup %368 }
  0x44   :  { %v208_v5 = vadd.f32 %v207_v60, %v204_v63  ;;  %v226_v7 = vmul.f32 %v491_v30, %v225_v4  ;;  %v229_v8 = vstv %s338_s8  ;;  %s344_s14 = sld [smem:[#allocation2 + $0x38]] }
  0x45   :  { %v223_v10 = vadd.f32 %v222_v3, %v219_v1  ;;  %v230_v11 = vmul.f32 %v501_v36, %v229_v8  ;;  %v233_v12 = vstv %s565_s9  ;;  %s345_s15 = sld [smem:[#allocation2 + $0x39]] }
  0x46   :  { %v212_v13 = vadd.f32 %v211_v0, %v208_v5  ;;  %v237_v14 = vstv %s568_s10  ;;  %v234_v16 = vmul.f32 %v508_v47, %v233_v12  ;;  %s346_s16 = sld [smem:[#allocation2 + $0x3a]] }
  0x47   :  { %v227_v15 = vadd.f32 %v226_v7, %v223_v10  ;;  %v238_v19 = vmul.f32 %v521_v57, %v237_v14  ;;  %v241_v29 = vstv %s570_s11  ;;  %s347_s17 = sld [smem:[#allocation2 + $0x3b]] }
  0x48   :  { %v215_v17 = vadd.f32 %v214_v6, %v212_v13  ;;  %v245_v30 = vstv %s342_s12  ;;  %s348_s18 = sld [smem:[#allocation2 + $0x3c]] }
  0x49   :  { %v231_v18 = vadd.f32 %v230_v11, %v227_v15  ;;  %v246_v20 = vmul.f32 %v365_v9, %v245_v30  ;;  %v248_v22 = vstv %s343_s13  ;;  %v371_v25 = vpop.eup %370 }
  0x4a   :  { %372 = vtanh.f32 %v215_v17  ;;  %v249_v36 = vmul.f32 %v367_v21, %v248_v22  ;;  %v252_v24 = vstv %s344_s14 }
  0x4b   :  { %v235_v26 = vadd.f32 %v234_v16, %v231_v18  ;;  %v253_v27 = vmul.f32 %v369_v23, %v252_v24  ;;  %v256_v28 = vstv %s345_s15 }
  0x4c   :  { %v250_v31 = vadd.f32 %v249_v36, %v246_v20  ;;  %v257_v33 = vmul.f32 %v371_v25, %v256_v28  ;;  %v260_v35 = vstv %s346_s16 }
  0x4d   :  { %v239_v32 = vadd.f32 %v238_v19, %v235_v26  ;;  %v264_v39 = vstv %s347_s17 }
  0x4e   :  { %v254_v47 = vadd.f32 %v253_v27, %v250_v31  ;;  %v268_v43 = vstv %s348_s18 }
  0x4f   :  { %v242_v34 = vadd.f32 %v241_v29, %v239_v32 }
  0x50   :  { %v373_v37 = vpop.eup %372  ;;  %v258_v57 = vadd.f32 %v257_v33, %v254_v47 }
  0x51   :  { %374 = vtanh.f32 %v242_v34  ;;  %v261_v38 = vmul.f32 %v373_v37, %v260_v35 }
  0x53   :  { %v262_v40 = vadd.f32 %v261_v38, %v258_v57 }
  0x57   :  { %v375_v41 = vpop.eup %374 }
  0x58   :  { %v265_v42 = vmul.f32 %v375_v41, %v264_v39 }
  0x5a   :  { %v266_v44 = vadd.f32 %v265_v42, %v262_v40 }
  0x5c   :  { %v269_v45 = vadd.f32 %v268_v43, %v266_v44 }
  0x5e   :  { %270 = vst [vmem:[#allocation7] sm:$0xff] %v269_v45 }
  0x5f   :  { %281 = dma.vmem_to_hbm [thread:$0]  %s277_s0, 128, %s279_s22, [#allocation4]  }
  0x60   :  { %440 = dma.done.wait [#allocation4], 128  }
  0x61   :  { %441 = vsyncadd [#allocation4], 4294967168 }
  0x62   :  { %286 = vsyncpa [#allocation3], 1 }
  0x63   :  { %287 = vsyncpa [#allocation4], 1 }
  0x64   :  { %288 = vsyncpa [#allocation5], 1 }

</bundles_post_ra>
